<compile_context>
chip_gen: v5e
topology: v5e:2x2
jax: 0.10.0
libtpu: 0.0.40
codegen_flags: <defaults>
</compile_context>

<pallas_src>
import functools

import jax
import jax.numpy as jnp
from jax.experimental import pallas as pl
from jax.experimental.pallas import tpu as pltpu


def _resblock_kernel(x_ref, w1_ref, b1_ref, w2_ref, b2_ref, m_ref, o_ref, *,
                     n_reps, width, negative_slope):
    """Block of images: x <- x + LReLU(BN(Conv3x3(LReLU(BN(Conv1x1(x)))))), n times."""
    c_out, lanes = o_ref.shape          # (C, imgs_per_block*H*W)
    c_mid = w1_ref.shape[0]             # C//2

    w1 = w1_ref[...]                    # (C//2, C)       bf16, BN1 folded
    w2 = w2_ref[...]                    # (C, 9*C//2)     bf16, BN2 folded, taps stacked on K
    masks = m_ref[...]                  # (9, lanes)      f32 in-bounds masks per tap

    # Hoist the bias lane-broadcasts out of the recurrence (no CSE of broadcast_in_dim).
    b1 = jnp.broadcast_to(b1_ref[...], (c_mid, lanes)).astype(jnp.float32)
    b2 = jnp.broadcast_to(b2_ref[...], (c_out, lanes)).astype(jnp.float32)

    def leaky(v):
        return jnp.where(v >= 0, v, negative_slope * v)

    # Static flat-lane shift for each tap of the padded 3x3 conv (tap = kh*3+kw).
    shifts = [(kh - 1) * width + (kw - 1) for kh in range(3) for kw in range(3)]

    def body(_, xc):
        # --- 1x1 conv (+folded BN) + LeakyReLU: one MXU matmul, bf16 in / f32 acc.
        y1 = leaky(jnp.dot(w1, xc.astype(jnp.bfloat16),
                           preferred_element_type=jnp.float32) + b1)

        # --- 3x3 conv (stride 1, pad 1): build the 9 shifted+masked tap operands
        # (XLU rolls + VPU mask-mults), stack them along sublanes and do a single
        # (C, 9*C_mid) x (9*C_mid, lanes) MXU matmul (K=72 instead of 9 K=8 passes).
        taps = []
        for tap, shift in enumerate(shifts):
            if shift == 0:
                taps.append(y1)
            else:
                rolled = pltpu.roll(y1, (-shift) % lanes, axis=1)   # XLU rotate
                taps.append(rolled * masks[tap:tap + 1, :])         # zero out-of-bounds
        stacked = jnp.concatenate(taps, axis=0).astype(jnp.bfloat16)  # (9*C_mid, lanes)

        y2 = leaky(jnp.dot(w2, stacked, preferred_element_type=jnp.float32) + b2)
        return xc + y2                                               # f32 residual carry

    out = jax.lax.fori_loop(0, n_reps, body, x_ref[...].astype(jnp.float32),
                            unroll=True)
    o_ref[...] = out.astype(o_ref.dtype)


def _fold_bn(w, b, gamma, beta, mean, var, eps=1e-5):
    """Fold eval-mode BatchNorm into conv weights/bias."""
    s = gamma / jnp.sqrt(var + eps)
    return w * s[:, None, None, None], (b - mean) * s + beta


def resblock_forward(x, params, n, negative_slope=0.01, num_blocks=None):
    """Pallas forward of ResBlock(n, C) on NCHW input x (eval-mode BN)."""
    N, C, H, W = x.shape
    assert C % 2 == 0 and C % 8 == 0, "C must be a multiple of 8 for sublane tiling"
    C_mid = C // 2
    lanes_img = H * W

    if num_blocks is None:
        num_blocks = 2 if (N % 2 == 0 and N >= 2) else 1    # 2 TensorCores on v7x
    assert N % num_blocks == 0
    imgs_per_block = N // num_blocks
    lanes_blk = imgs_per_block * lanes_img
    assert lanes_blk % 128 == 0, "imgs_per_block*H*W must be a multiple of 128"

    # --- fold eval-mode BN into the two convs; all reshapes done in the wrapper.
    w1f, b1f = _fold_bn(params["w1"], params["bc1"], params["g1"],
                        params["be1"], params["m1"], params["v1"])
    w2f, b2f = _fold_bn(params["w2"], params["bc2"], params["g2"],
                        params["be2"], params["m2"], params["v2"])
    w1_k = w1f[:, :, 0, 0].astype(jnp.bfloat16)                               # (C//2, C)
    # Taps stacked along K in tap order kh*3+kw -> (C, 9*C//2), bf16 for the MXU.
    w2_k = jnp.transpose(w2f, (0, 2, 3, 1)).reshape(C, 9 * C_mid).astype(jnp.bfloat16)
    b1_k = b1f.reshape(C_mid, 1).astype(jnp.float32)
    b2_k = b2f.reshape(C, 1).astype(jnp.float32)

    # In-bounds masks for the 9 taps of the padded 3x3 conv (flat index h*W+w),
    # tiled across the images of one block so lane rolls never cross image borders.
    hh = jnp.arange(H)[:, None]
    ww = jnp.arange(W)[None, :]
    mask_rows = []
    for kh in range(3):
        for kw in range(3):
            dh, dw = kh - 1, kw - 1
            valid = ((hh + dh >= 0) & (hh + dh < H) &
                     (ww + dw >= 0) & (ww + dw < W))
            mask_rows.append(valid.reshape(lanes_img))
    masks_img = jnp.stack(mask_rows).astype(jnp.float32)                      # (9, H*W)
    masks_blk = jnp.tile(masks_img, (1, imgs_per_block))                      # (9, lanes_blk)

    # Lane-dense slab: channels on sublanes, flattened (image, spatial) on lanes.
    x2d = jnp.transpose(x, (1, 0, 2, 3)).reshape(C, N * lanes_img)

    flops = 2 * n * N * lanes_img * (C * C_mid + 9 * C_mid * C)
    bytes_accessed = (2 * N * C * lanes_img * x.dtype.itemsize
                      + w1_k.size * 2 + w2_k.size * 2
                      + b1_k.size * 4 + b2_k.size * 4 + masks_blk.size * 4)

    kernel = functools.partial(_resblock_kernel, n_reps=n, width=W,
                               negative_slope=negative_slope)
    out2d = pl.pallas_call(
        kernel,
        out_shape=jax.ShapeDtypeStruct((C, N * lanes_img), x.dtype),
        grid_spec=pltpu.PrefetchScalarGridSpec(
            num_scalar_prefetch=0,
            grid=(num_blocks,),
            in_specs=[
                pl.BlockSpec((C, lanes_blk), lambda i: (0, i)),        # activations
                pl.BlockSpec((C_mid, C), lambda i: (0, 0)),            # folded w1 (bf16)
                pl.BlockSpec((C_mid, 1), lambda i: (0, 0)),            # folded b1
                pl.BlockSpec((C, 9 * C_mid), lambda i: (0, 0)),        # folded w2 (bf16)
                pl.BlockSpec((C, 1), lambda i: (0, 0)),                # folded b2
                pl.BlockSpec((9, lanes_blk), lambda i: (0, 0)),        # tap masks
            ],
            out_specs=pl.BlockSpec((C, lanes_blk), lambda i: (0, i)),
        ),
        compiler_params=pltpu.CompilerParams(
            dimension_semantics=("parallel",)),
        cost_estimate=pl.CostEstimate(flops=flops, transcendentals=0,
                                      bytes_accessed=bytes_accessed),
    )(x2d, w1_k, b1_k, w2_k, b2_k, masks_blk)

    return jnp.transpose(out2d.reshape(C, N, H, W), (1, 0, 2, 3))


# ----------------------------- pure-JAX reference -----------------------------

def _conv2d_nchw(x, w, b, padding):
    y = jax.lax.conv_general_dilated(
        x, w, window_strides=(1, 1),
        padding=[(padding, padding), (padding, padding)],
        dimension_numbers=("NCHW", "OIHW", "NCHW"),
        precision=jax.lax.Precision.HIGHEST)
    return y + b.reshape(1, -1, 1, 1)


def _bn_eval(x, gamma, beta, mean, var, eps=1e-5):
    s = (gamma / jnp.sqrt(var + eps)).reshape(1, -1, 1, 1)
    return (x - mean.reshape(1, -1, 1, 1)) * s + beta.reshape(1, -1, 1, 1)


def _leaky(x, slope=0.01):
    return jnp.where(x >= 0, x, slope * x)


def resblock_reference(x, p, n):
    for _ in range(n):
        h = _leaky(_bn_eval(_conv2d_nchw(x, p["w1"], p["bc1"], 0),
                            p["g1"], p["be1"], p["m1"], p["v1"]))
        h = _leaky(_bn_eval(_conv2d_nchw(h, p["w2"], p["bc2"], 1),
                            p["g2"], p["be2"], p["m2"], p["v2"]))
        x = x + h
    return x


if __name__ == "__main__":
    N, C, H, W = 2, 16, 16, 16
    n = 2
    C_mid = C // 2

    ks = jax.random.split(jax.random.PRNGKey(0), 13)
    x = jax.random.normal(ks[0], (N, C, H, W), jnp.float32)
    params = {
        "w1": 0.2 * jax.random.normal(ks[1], (C_mid, C, 1, 1), jnp.float32),
        "bc1": 0.1 * jax.random.normal(ks[2], (C_mid,), jnp.float32),
        "g1": 1.0 + 0.1 * jax.random.normal(ks[3], (C_mid,), jnp.float32),
        "be1": 0.1 * jax.random.normal(ks[4], (C_mid,), jnp.float32),
        "m1": 0.1 * jax.random.normal(ks[5], (C_mid,), jnp.float32),
        "v1": 0.5 + jax.random.uniform(ks[6], (C_mid,), jnp.float32),
        "w2": 0.1 * jax.random.normal(ks[7], (C, C_mid, 3, 3), jnp.float32),
        "bc2": 0.1 * jax.random.normal(ks[8], (C,), jnp.float32),
        "g2": 1.0 + 0.1 * jax.random.normal(ks[9], (C,), jnp.float32),
        "be2": 0.1 * jax.random.normal(ks[10], (C,), jnp.float32),
        "m2": 0.1 * jax.random.normal(ks[11], (C,), jnp.float32),
        "v2": 0.5 + jax.random.uniform(ks[12], (C,), jnp.float32),
    }

    out = resblock_forward(x, params, n)
    out = jax.block_until_ready(out)

    ref = resblock_reference(x, params, n)
    assert out.shape == x.shape
    assert out.dtype == x.dtype
    max_err = float(jnp.max(jnp.abs(out - ref)))
    # Tolerance accounts for bf16 MXU operands (f32 accumulation, f32 reference).
    assert jnp.allclose(out, ref, atol=5e-2, rtol=5e-2), max_err

    print("KERNEL_OK")
</pallas_src>

<mosaic_0001>
module attributes {stable_mosaic.version = 11 : i64} {
  func.func @_resblock_kernel(%arg0: i32, %arg1: memref<16x256xf32, #tpu.memory_space<vmem>>, %arg2: memref<8x16xbf16, #tpu.memory_space<vmem>>, %arg3: memref<8x1xf32, #tpu.memory_space<vmem>>, %arg4: memref<16x72xbf16, #tpu.memory_space<vmem>>, %arg5: memref<16x1xf32, #tpu.memory_space<vmem>>, %arg6: memref<9x256xf32, #tpu.memory_space<vmem>>, %arg7: memref<16x256xf32, #tpu.memory_space<vmem>>) attributes {dimension_semantics = [#tpu.dimension_semantics<parallel>], iteration_bounds = array<i64: 2>, scalar_prefetch = 0 : i64, scratch_operands = 0 : i64, tpu.core_type = #tpu.core_type<tc>, window_params = [{transform_indices = @transform_0, window_bounds = array<i64: 16, 256>}, {pipeline_mode = #tpu.pipeline_mode<synchronous>, transform_indices = @transform_1, window_bounds = array<i64: 8, 16>}, {pipeline_mode = #tpu.pipeline_mode<synchronous>, transform_indices = @transform_2, window_bounds = array<i64: 8, 1>}, {pipeline_mode = #tpu.pipeline_mode<synchronous>, transform_indices = @transform_3, window_bounds = array<i64: 16, 72>}, {pipeline_mode = #tpu.pipeline_mode<synchronous>, transform_indices = @transform_4, window_bounds = array<i64: 16, 1>}, {pipeline_mode = #tpu.pipeline_mode<synchronous>, transform_indices = @transform_5, window_bounds = array<i64: 9, 256>}, {transform_indices = @transform_6, window_bounds = array<i64: 16, 256>}]} {
    %c0 = arith.constant 0 : index
    %c0_0 = arith.constant 0 : index
    %0 = vector.load %arg2[%c0, %c0_0] : memref<8x16xbf16, #tpu.memory_space<vmem>>, vector<8x16xbf16>
    %c0_1 = arith.constant 0 : index
    %c0_2 = arith.constant 0 : index
    %1 = vector.load %arg4[%c0_1, %c0_2] : memref<16x72xbf16, #tpu.memory_space<vmem>>, vector<16x72xbf16>
    %c0_3 = arith.constant 0 : index
    %c0_4 = arith.constant 0 : index
    %2 = vector.load %arg6[%c0_3, %c0_4] : memref<9x256xf32, #tpu.memory_space<vmem>>, vector<9x256xf32>
    %c0_5 = arith.constant 0 : index
    %c0_6 = arith.constant 0 : index
    %3 = vector.load %arg3[%c0_5, %c0_6] : memref<8x1xf32, #tpu.memory_space<vmem>>, vector<8x1xf32>
    %4 = vector.shape_cast %3 : vector<8x1xf32> to vector<8x1xf32>
    %5 = vector.broadcast %4 : vector<8x1xf32> to vector<8x256xf32>
    %c0_7 = arith.constant 0 : index
    %c0_8 = arith.constant 0 : index
    %6 = vector.load %arg5[%c0_7, %c0_8] : memref<16x1xf32, #tpu.memory_space<vmem>>, vector<16x1xf32>
    %7 = vector.shape_cast %6 : vector<16x1xf32> to vector<16x1xf32>
    %8 = vector.broadcast %7 : vector<16x1xf32> to vector<16x256xf32>
    %c0_9 = arith.constant 0 : index
    %c0_10 = arith.constant 0 : index
    %9 = vector.load %arg1[%c0_9, %c0_10] : memref<16x256xf32, #tpu.memory_space<vmem>>, vector<16x256xf32>
    %c0_i32 = arith.constant 0 : i32
    %10 = arith.truncf %9 : vector<16x256xf32> to vector<16x256xbf16>
    %cst = arith.constant dense<0.000000e+00> : vector<8x256xf32>
    %11 = tpu.matmul %0, %10, %cst {dimension_numbers = #tpu.dot_dimension_numbers<[1], [0], [0], [1], [0, 0, 1, 1], [], []>} : vector<8x16xbf16>, vector<16x256xbf16>, vector<8x256xf32> -> vector<8x256xf32>
    %12 = arith.addf %11, %5 : vector<8x256xf32>
    %cst_11 = arith.constant 0.000000e+00 : f32
    %13 = vector.broadcast %cst_11 : f32 to vector<8x256xf32>
    %14 = arith.cmpf oge, %12, %13 : vector<8x256xf32>
    %cst_12 = arith.constant 0.00999999977 : f32
    %15 = vector.broadcast %cst_12 : f32 to vector<8x256xf32>
    %16 = arith.mulf %15, %12 : vector<8x256xf32>
    %17 = arith.select %14, %12, %16 : vector<8x256xi1>, vector<8x256xf32>
    %c17_i32 = arith.constant 17 : i32
    %18 = tpu.dynamic_rotate %17 by %c17_i32 dim 1 : vector<8x256xf32>, i32 -> vector<8x256xf32>
    %19 = vector.extract_strided_slice %2 {offsets = [0, 0], sizes = [1, 256], strides = [1, 1]} : vector<9x256xf32> to vector<1x256xf32>
    %20 = vector.broadcast %19 : vector<1x256xf32> to vector<8x256xf32>
    %21 = arith.mulf %18, %20 : vector<8x256xf32>
    %c16_i32 = arith.constant 16 : i32
    %22 = tpu.dynamic_rotate %17 by %c16_i32 dim 1 : vector<8x256xf32>, i32 -> vector<8x256xf32>
    %23 = vector.extract_strided_slice %2 {offsets = [1, 0], sizes = [1, 256], strides = [1, 1]} : vector<9x256xf32> to vector<1x256xf32>
    %24 = vector.broadcast %23 : vector<1x256xf32> to vector<8x256xf32>
    %25 = arith.mulf %22, %24 : vector<8x256xf32>
    %c15_i32 = arith.constant 15 : i32
    %26 = tpu.dynamic_rotate %17 by %c15_i32 dim 1 : vector<8x256xf32>, i32 -> vector<8x256xf32>
    %27 = vector.extract_strided_slice %2 {offsets = [2, 0], sizes = [1, 256], strides = [1, 1]} : vector<9x256xf32> to vector<1x256xf32>
    %28 = vector.broadcast %27 : vector<1x256xf32> to vector<8x256xf32>
    %29 = arith.mulf %26, %28 : vector<8x256xf32>
    %c1_i32 = arith.constant 1 : i32
    %30 = tpu.dynamic_rotate %17 by %c1_i32 dim 1 : vector<8x256xf32>, i32 -> vector<8x256xf32>
    %31 = vector.extract_strided_slice %2 {offsets = [3, 0], sizes = [1, 256], strides = [1, 1]} : vector<9x256xf32> to vector<1x256xf32>
    %32 = vector.broadcast %31 : vector<1x256xf32> to vector<8x256xf32>
    %33 = arith.mulf %30, %32 : vector<8x256xf32>
    %c255_i32 = arith.constant 255 : i32
    %34 = tpu.dynamic_rotate %17 by %c255_i32 dim 1 : vector<8x256xf32>, i32 -> vector<8x256xf32>
    %35 = vector.extract_strided_slice %2 {offsets = [5, 0], sizes = [1, 256], strides = [1, 1]} : vector<9x256xf32> to vector<1x256xf32>
    %36 = vector.broadcast %35 : vector<1x256xf32> to vector<8x256xf32>
    %37 = arith.mulf %34, %36 : vector<8x256xf32>
    %c241_i32 = arith.constant 241 : i32
    %38 = tpu.dynamic_rotate %17 by %c241_i32 dim 1 : vector<8x256xf32>, i32 -> vector<8x256xf32>
    %39 = vector.extract_strided_slice %2 {offsets = [6, 0], sizes = [1, 256], strides = [1, 1]} : vector<9x256xf32> to vector<1x256xf32>
    %40 = vector.broadcast %39 : vector<1x256xf32> to vector<8x256xf32>
    %41 = arith.mulf %38, %40 : vector<8x256xf32>
    %c240_i32 = arith.constant 240 : i32
    %42 = tpu.dynamic_rotate %17 by %c240_i32 dim 1 : vector<8x256xf32>, i32 -> vector<8x256xf32>
    %43 = vector.extract_strided_slice %2 {offsets = [7, 0], sizes = [1, 256], strides = [1, 1]} : vector<9x256xf32> to vector<1x256xf32>
    %44 = vector.broadcast %43 : vector<1x256xf32> to vector<8x256xf32>
    %45 = arith.mulf %42, %44 : vector<8x256xf32>
    %c239_i32 = arith.constant 239 : i32
    %46 = tpu.dynamic_rotate %17 by %c239_i32 dim 1 : vector<8x256xf32>, i32 -> vector<8x256xf32>
    %47 = vector.extract_strided_slice %2 {offsets = [8, 0], sizes = [1, 256], strides = [1, 1]} : vector<9x256xf32> to vector<1x256xf32>
    %48 = vector.broadcast %47 : vector<1x256xf32> to vector<8x256xf32>
    %49 = arith.mulf %46, %48 : vector<8x256xf32>
    %50 = tpu.concatenate %21, %25, %29, %33, %17, %37, %41, %45, %49 in 0 : vector<8x256xf32>, vector<8x256xf32>, vector<8x256xf32>, vector<8x256xf32>, vector<8x256xf32>, vector<8x256xf32>, vector<8x256xf32>, vector<8x256xf32>, vector<8x256xf32> -> vector<72x256xf32>
    %51 = arith.truncf %50 : vector<72x256xf32> to vector<72x256xbf16>
    %cst_13 = arith.constant dense<0.000000e+00> : vector<16x256xf32>
    %52 = tpu.matmul %1, %51, %cst_13 {dimension_numbers = #tpu.dot_dimension_numbers<[1], [0], [0], [1], [0, 0, 1, 1], [], []>} : vector<16x72xbf16>, vector<72x256xbf16>, vector<16x256xf32> -> vector<16x256xf32>
    %53 = arith.addf %52, %8 : vector<16x256xf32>
    %cst_14 = arith.constant 0.000000e+00 : f32
    %54 = vector.broadcast %cst_14 : f32 to vector<16x256xf32>
    %55 = arith.cmpf oge, %53, %54 : vector<16x256xf32>
    %cst_15 = arith.constant 0.00999999977 : f32
    %56 = vector.broadcast %cst_15 : f32 to vector<16x256xf32>
    %57 = arith.mulf %56, %53 : vector<16x256xf32>
    %58 = arith.select %55, %53, %57 : vector<16x256xi1>, vector<16x256xf32>
    %59 = arith.addf %9, %58 : vector<16x256xf32>
    %c1_i32_16 = arith.constant 1 : i32
    %60 = arith.truncf %59 : vector<16x256xf32> to vector<16x256xbf16>
    %cst_17 = arith.constant dense<0.000000e+00> : vector<8x256xf32>
    %61 = tpu.matmul %0, %60, %cst_17 {dimension_numbers = #tpu.dot_dimension_numbers<[1], [0], [0], [1], [0, 0, 1, 1], [], []>} : vector<8x16xbf16>, vector<16x256xbf16>, vector<8x256xf32> -> vector<8x256xf32>
    %62 = arith.addf %61, %5 : vector<8x256xf32>
    %cst_18 = arith.constant 0.000000e+00 : f32
    %63 = vector.broadcast %cst_18 : f32 to vector<8x256xf32>
    %64 = arith.cmpf oge, %62, %63 : vector<8x256xf32>
    %cst_19 = arith.constant 0.00999999977 : f32
    %65 = vector.broadcast %cst_19 : f32 to vector<8x256xf32>
    %66 = arith.mulf %65, %62 : vector<8x256xf32>
    %67 = arith.select %64, %62, %66 : vector<8x256xi1>, vector<8x256xf32>
    %c17_i32_20 = arith.constant 17 : i32
    %68 = tpu.dynamic_rotate %67 by %c17_i32_20 dim 1 : vector<8x256xf32>, i32 -> vector<8x256xf32>
    %69 = vector.extract_strided_slice %2 {offsets = [0, 0], sizes = [1, 256], strides = [1, 1]} : vector<9x256xf32> to vector<1x256xf32>
    %70 = vector.broadcast %69 : vector<1x256xf32> to vector<8x256xf32>
    %71 = arith.mulf %68, %70 : vector<8x256xf32>
    %c16_i32_21 = arith.constant 16 : i32
    %72 = tpu.dynamic_rotate %67 by %c16_i32_21 dim 1 : vector<8x256xf32>, i32 -> vector<8x256xf32>
    %73 = vector.extract_strided_slice %2 {offsets = [1, 0], sizes = [1, 256], strides = [1, 1]} : vector<9x256xf32> to vector<1x256xf32>
    %74 = vector.broadcast %73 : vector<1x256xf32> to vector<8x256xf32>
    %75 = arith.mulf %72, %74 : vector<8x256xf32>
    %c15_i32_22 = arith.constant 15 : i32
    %76 = tpu.dynamic_rotate %67 by %c15_i32_22 dim 1 : vector<8x256xf32>, i32 -> vector<8x256xf32>
    %77 = vector.extract_strided_slice %2 {offsets = [2, 0], sizes = [1, 256], strides = [1, 1]} : vector<9x256xf32> to vector<1x256xf32>
    %78 = vector.broadcast %77 : vector<1x256xf32> to vector<8x256xf32>
    %79 = arith.mulf %76, %78 : vector<8x256xf32>
    %c1_i32_23 = arith.constant 1 : i32
    %80 = tpu.dynamic_rotate %67 by %c1_i32_23 dim 1 : vector<8x256xf32>, i32 -> vector<8x256xf32>
    %81 = vector.extract_strided_slice %2 {offsets = [3, 0], sizes = [1, 256], strides = [1, 1]} : vector<9x256xf32> to vector<1x256xf32>
    %82 = vector.broadcast %81 : vector<1x256xf32> to vector<8x256xf32>
    %83 = arith.mulf %80, %82 : vector<8x256xf32>
    %c255_i32_24 = arith.constant 255 : i32
    %84 = tpu.dynamic_rotate %67 by %c255_i32_24 dim 1 : vector<8x256xf32>, i32 -> vector<8x256xf32>
    %85 = vector.extract_strided_slice %2 {offsets = [5, 0], sizes = [1, 256], strides = [1, 1]} : vector<9x256xf32> to vector<1x256xf32>
    %86 = vector.broadcast %85 : vector<1x256xf32> to vector<8x256xf32>
    %87 = arith.mulf %84, %86 : vector<8x256xf32>
    %c241_i32_25 = arith.constant 241 : i32
    %88 = tpu.dynamic_rotate %67 by %c241_i32_25 dim 1 : vector<8x256xf32>, i32 -> vector<8x256xf32>
    %89 = vector.extract_strided_slice %2 {offsets = [6, 0], sizes = [1, 256], strides = [1, 1]} : vector<9x256xf32> to vector<1x256xf32>
    %90 = vector.broadcast %89 : vector<1x256xf32> to vector<8x256xf32>
    %91 = arith.mulf %88, %90 : vector<8x256xf32>
    %c240_i32_26 = arith.constant 240 : i32
    %92 = tpu.dynamic_rotate %67 by %c240_i32_26 dim 1 : vector<8x256xf32>, i32 -> vector<8x256xf32>
    %93 = vector.extract_strided_slice %2 {offsets = [7, 0], sizes = [1, 256], strides = [1, 1]} : vector<9x256xf32> to vector<1x256xf32>
    %94 = vector.broadcast %93 : vector<1x256xf32> to vector<8x256xf32>
    %95 = arith.mulf %92, %94 : vector<8x256xf32>
    %c239_i32_27 = arith.constant 239 : i32
    %96 = tpu.dynamic_rotate %67 by %c239_i32_27 dim 1 : vector<8x256xf32>, i32 -> vector<8x256xf32>
    %97 = vector.extract_strided_slice %2 {offsets = [8, 0], sizes = [1, 256], strides = [1, 1]} : vector<9x256xf32> to vector<1x256xf32>
    %98 = vector.broadcast %97 : vector<1x256xf32> to vector<8x256xf32>
    %99 = arith.mulf %96, %98 : vector<8x256xf32>
    %100 = tpu.concatenate %71, %75, %79, %83, %67, %87, %91, %95, %99 in 0 : vector<8x256xf32>, vector<8x256xf32>, vector<8x256xf32>, vector<8x256xf32>, vector<8x256xf32>, vector<8x256xf32>, vector<8x256xf32>, vector<8x256xf32>, vector<8x256xf32> -> vector<72x256xf32>
    %101 = arith.truncf %100 : vector<72x256xf32> to vector<72x256xbf16>
    %cst_28 = arith.constant dense<0.000000e+00> : vector<16x256xf32>
    %102 = tpu.matmul %1, %101, %cst_28 {dimension_numbers = #tpu.dot_dimension_numbers<[1], [0], [0], [1], [0, 0, 1, 1], [], []>} : vector<16x72xbf16>, vector<72x256xbf16>, vector<16x256xf32> -> vector<16x256xf32>
    %103 = arith.addf %102, %8 : vector<16x256xf32>
    %cst_29 = arith.constant 0.000000e+00 : f32
    %104 = vector.broadcast %cst_29 : f32 to vector<16x256xf32>
    %105 = arith.cmpf oge, %103, %104 : vector<16x256xf32>
    %cst_30 = arith.constant 0.00999999977 : f32
    %106 = vector.broadcast %cst_30 : f32 to vector<16x256xf32>
    %107 = arith.mulf %106, %103 : vector<16x256xf32>
    %108 = arith.select %105, %103, %107 : vector<16x256xi1>, vector<16x256xf32>
    %109 = arith.addf %59, %108 : vector<16x256xf32>
    %c0_31 = arith.constant 0 : index
    %c0_32 = arith.constant 0 : index
    %110 = vector.load %arg7[%c0_31, %c0_32] : memref<16x256xf32, #tpu.memory_space<vmem>>, vector<16x256xf32>
    tpu.vector_store %arg7[%c0_31, %c0_32], %109 {strides = array<i32>} : memref<16x256xf32, #tpu.memory_space<vmem>>, vector<16x256xf32>,
    return
  }
  func.func @transform_0(%arg0: i32) -> (i32, i32) {
    %c0_i32 = arith.constant 0 : i32
    %c0_i32_0 = arith.constant 0 : i32
    return %c0_i32, %arg0 : i32, i32
  }
  func.func @transform_1(%arg0: i32) -> (i32, i32) {
    %c0_i32 = arith.constant 0 : i32
    %c0_i32_0 = arith.constant 0 : i32
    %c0_i32_1 = arith.constant 0 : i32
    return %c0_i32, %c0_i32_0 : i32, i32
  }
  func.func @transform_2(%arg0: i32) -> (i32, i32) {
    %c0_i32 = arith.constant 0 : i32
    %c0_i32_0 = arith.constant 0 : i32
    %c0_i32_1 = arith.constant 0 : i32
    return %c0_i32, %c0_i32_0 : i32, i32
  }
  func.func @transform_3(%arg0: i32) -> (i32, i32) {
    %c0_i32 = arith.constant 0 : i32
    %c0_i32_0 = arith.constant 0 : i32
    %c0_i32_1 = arith.constant 0 : i32
    return %c0_i32, %c0_i32_0 : i32, i32
  }
  func.func @transform_4(%arg0: i32) -> (i32, i32) {
    %c0_i32 = arith.constant 0 : i32
    %c0_i32_0 = arith.constant 0 : i32
    %c0_i32_1 = arith.constant 0 : i32
    return %c0_i32, %c0_i32_0 : i32, i32
  }
  func.func @transform_5(%arg0: i32) -> (i32, i32) {
    %c0_i32 = arith.constant 0 : i32
    %c0_i32_0 = arith.constant 0 : i32
    %c0_i32_1 = arith.constant 0 : i32
    return %c0_i32, %c0_i32_0 : i32, i32
  }
  func.func @transform_6(%arg0: i32) -> (i32, i32) {
    %c0_i32 = arith.constant 0 : i32
    %c0_i32_0 = arith.constant 0 : i32
    return %c0_i32, %arg0 : i32, i32
  }
}

</mosaic_0001>

<bundles_post_ra>
// kernel: tpu_custom_call.1
= control target key start
LH: loop header
LB: loop body
LE: loop exit
PB: predicated region body
PF: predicated region fallthrough
CT: control target
= control target key end

     0   :  { %s1517_s0 = inlined_call_operand.hbm [shape: f32[16,512], index: 0, kind: input, shape index: {}]   ;;  %s1518_s1 = inlined_call_operand.vmem [shape: bf16[8,16], index: 1, kind: input, shape index: {}]   ;;  %s1519_s2 = inlined_call_operand.vmem [shape: f32[8,1], index: 2, kind: input, shape index: {}]   ;;  %s1520_s3 = inlined_call_operand.vmem [shape: bf16[16,72], index: 3, kind: input, shape index: {}]   ;;  %s1521_s4 = inlined_call_operand.vmem [shape: f32[16,1], index: 4, kind: input, shape index: {}]   ;;  %s1522_s5 = inlined_call_operand.hbm [shape: f32[9,256], index: 5, kind: input, shape index: {}]   ;;  %s1523_s6 = inlined_call_operand.hbm [shape: f32[16,512], index: 6, kind: output, shape index: {}]  }
   0x1   :  { %1526 = sst [smem:[#allocation11_spill]] %s1522_s5 }
   0x2   :  { %11 = vsyncpa [#allocation3], 0 }
   0x3   :  { %13 = vsyncpa [#allocation3 + $0x1], 0 }
   0x4   :  { %14 = vsyncpa [#allocation6], 0 }
   0x5   :  { %15 = vsyncpa [#allocation4], 0 }
   0x6   :  { %17 = vsyncpa [#allocation4 + $0x1], 0  ;;  %s1068_s21 = smov 0   ;;  %s1070_s22 = smov 0  }
   0x7   :  { %s1072_s23 = smov 0   ;;  %s1074_s24 = smov 0  }
   0x8 LB: > { %s1089_s25 = sadd.s32 4294967295, %s1016_s24   ;;  %s780_s26 = sadd.s32 4294967294, %s1016_s24   ;;  %s1016_s24 = sphi %s1074_s24, %s1539_s24   ;;  %s1012_s23 = sphi %s1072_s23, %s1538_s23   ;;  %s1008_s22 = sphi %s1070_s22, %s1537_s22   ;;  %s1004_s21 = sphi %s1068_s21, %s1536_s21  }
   0x9   : > { %p43_p0 = scmp.ne.s32.totalorder %s1008_s22, %s1004_s21  ;;  %p44_p1 = scmp.eq.s32.totalorder %s1089_s25, 0 }
   0xa   : > { %p172_p2 = scmp.eq.s32.totalorder %s1089_s25, 1  ;;  %p178_p3 = scmp.eq.s32.totalorder %s780_s26, 1 }
   0xb   : > { %p1098_p4 = por %p44_p1, %p43_p0  ;;  %p781_p5 = scmp.ge.s32.totalorder %s1016_s24, 1 }
   0xc   : > { %p1103_p6 = por %p178_p3, %p43_p0  ;;  %p185_p7 = scmp.lt.s32.totalorder %s1016_s24, 3 }
   0xd   : > { %s1529_s5 = sld [smem:[#allocation11_spill]]  ;;  %s1018_s9 = smov [#allocation5]  }
   0xe   : > { %p1111_p8 = pnand %p781_p5, %p185_p7  ;;  %s210_s10 = sshll.u32 %s1018_s9, 4  ;;  %s211_s10 = int_to_ptr.vmem [resolvable:$true] %s210_s10 }
   0xf   : > { %s1121_s11 = sadd.s32 1, %s1016_s24   ;;  %s1524_s12 = smov 256  }
  0x10   : > { %p819_p9 = pneg %p1111_p8  ;;  %s1525_s13 = smov 16  }
  0x11   : > { %s27_s14 = ssub.s32 %s1016_s24, %s1121_s11  ;;  %s30_s15 = sadd.s32 1, %s1012_s23 }
  0x12   : > { %p820_p10 = pnand %p819_p9, %p44_p1  ;;  %p28_p12 = scmp.eq.s32.totalorder %s27_s14, 0 }
  0x13   : > { %s208_s7 = sshll.u32 %s1529_s5, 4  ;;  %p37_p13 = scmp.ne.s32.totalorder %s1012_s23, %s1008_s22  ;;  %s209_s7 = int_to_ptr.hbm [resolvable:$true] %s208_s7 }
  0x14   : > { %822 = dma.hbm_to_vmem [thread:$0]  (!%p820_p10), %s209_s7, 512, %s211_s10, [#allocation6], %s1524_s12, %s1524_s12, %s1525_s13  }
  0x15   : > { %p38_p0 = scmp.eq.s32.totalorder %s1016_s24, 0  ;;  %p832_p3 = scmp.lt.s32.totalorder %s1016_s24, 2 }
  0x16   : > { %s1134_s16 = scalar_select %p28_p12, %s1012_s23, %s30_s15  }
  0x17   : > { %p39_p5 = por %p38_p0, %p37_p13  ;;  %p1138_p7 = por %p172_p2, %p37_p13 }
  0x18   : > { %s224_s18 = sand.u32 1, %s1012_s23   ;;  %s808_s19 = sshll.u32 %s1016_s24, 4 }
  0x19   : > { %s784_s20 = sshll.u32 %s224_s18, 5  ;;  %s233_s30 = scalar_lea.hbm %s1517_s0, %s808_s19 }
  0x1a   : > { %s234_s7 = sshll.u32 %s233_s30, 4  ;;  %s228_s9 = scalar_lea.vmem [#allocation2], %s784_s20  ;;  %s235_s7 = int_to_ptr.hbm [resolvable:$true] %s234_s7 }
  0x1b   : > { %s236_s10 = sshll.u32 %s228_s9, 4  ;;  %p1149_p9 = pnand %p832_p3, %p39_p5  ;;  %s237_s10 = int_to_ptr.vmem [resolvable:$true] %s236_s10 }
  0x1c   : > { %s225_s15 = scalar_lea.sflag [#allocation3], %s224_s18  ;;  %s916_s12 = sshra.s32 %s235_s7, 4  ;;  %s917_s12 = int_to_ptr.hbm [resolvable:$true] %s916_s12 }
  0x1d   : > { %s918_s13 = scalar_lea.hbm %s917_s12, 32  ;;  %p920_p10 = pneg %p1149_p9 }
  0x1e   : > { %p919_p2 = scmp.ne.s32.totalorder %s917_s12, %s918_s13  ;;  %s923_s26 = scalar_lea.hbm %s1517_s0, 64 }
  0x1f   : > { %p924_p0 = scmp.lt.s32.totalorder %s917_s12, %s1517_s0  ;;  %p925_p3 = scmp.lt.s32.totalorder %s923_s26, %s918_s13 }
  0x20   : > { %p921_p12 = pnand %p920_p10, %p919_p2 }
  0x21   : > { %p926_p5 = por %p925_p3, %p924_p0 }
  0x22   : > { %p922_p13 = pneg %p921_p12 }
  0x24   : > { %p927_p11 = pnand %p926_p5, %p922_p13 }
  0x26   : > { %930 = shalt.err (!%p927_p11)
}
  0x27   : > { %s1021_s18 = smov 512   ;;  %s1533_s9 = smov 16  }
  0x28   : > { %s1534_s5 = smov 256   ;;  %248 = sbr.rel (%p1111_p8) target bundleno = 948 (0x3b4), region = 44 }
  0x29   : > { %826 = dma.hbm_to_vmem [thread:$0]  (!%p1149_p9), %s235_s7, 512, %s237_s10, %s225_s15, %s1021_s18, %s1534_s5, %s1533_s9  }
  0x2a   : > { %s1168_s19 = sand.u32 (!%p1111_p8), 1, %s1008_s22  }
  0x2b   : > { %s788_s12 = sshll.u32 (!%p1111_p8), %s1168_s19, 5  ;;  %s251_s13 = scalar_lea.sflag (!%p1111_p8), [#allocation3], %s1168_s19 }
  0x2c   : > { %s254_s20 = scalar_lea.vmem (!%p1111_p8), [#allocation2], %s788_s12 }
  0x2d   : > { %991 = dma.done.wait (%p1098_p4), %s251_s13, 512  }
  0x2e   : > { %993 = vsyncadd (%p1098_p4), %s251_s13, 4294966784 }
  0x2f   : > { %995 = dma.done.wait (%p44_p1), [#allocation6], 512  }
  0x30   : > { %997 = vsyncadd (%p44_p1), [#allocation6], 4294966784  ;;  %v1022_v0 = vmov 0   ;;  %v1182_v1 = vld [vmem:[%s254_s20] sm:$0xff]  ;;  %v1184_v2 = vld [vmem:[%s254_s20 + $0x10] sm:$0xff]  ;;  %vm323_vm0 = vcmask 130048   ;;  %v363_v21 = vlaneseq }
  0x31   : > { %882 = vset.pattern.permute.xlu0 %v1022_v0  ;;  %883 = vset.pattern.permute.xlu2 %v1022_v0  ;;  %v1186_v3 = vld [vmem:[%s254_s20 + $0x8] sm:$0xff]  ;;  %v321_v4 = vpack.c.bf16 %v1184_v2, %v1182_v1  ;;  %v1190_v5 = vld [vmem:[%s254_s20 + $0x18] sm:$0xff]  ;;  %v299_v6 = vld [vmem:[%s1519_s2] sm:$0xff]  ;;  %s1023_s10 = smov 111   ;;  %s1024_s14 = smov 113   ;;  %vm468_vm4 = vcmask 1043456  }
  0x32   : > { %v322_v7 = vpack.c.bf16 %v1190_v5, %v1186_v3  ;;  %302 = vperm.xlu0 %882, %v299_v6   ;;  %v1200_v8 = vld [vmem:[%s1518_s1] sm:$0xf]  ;;  %s1025_s15 = smov 112   ;;  %s1026_s26 = smov 15   ;;  %v306_v20 = vld [vmem:[%s1521_s4 + $0x8] sm:$0xff]  ;;  %v1249_v23 = vand.u32 127, %v363_v21 }
  0x33   : > { %334 = vmatpush.bf16.msra.mxu2 %v321_v4  ;;  %s1027_s29 = smov 127   ;;  %s1028_s30 = smov 1   ;;  %v1252_v24 = vld [vmem:[#allocation5 + $0x10] ss:$0 sm:$0xff]  ;;  %v1254_v25 = vld [vmem:[#allocation5 + $0x18] ss:$0 sm:$0xff] }
  0x34   : > { %347 = vmatpush.bf16.msra.mxu3 %v322_v7  ;;  %s1029_s18 = smov 16   ;;  %s1030_s9 = smov 17   ;;  %vm442_vm3 = vcmp.lt.s32.totalorder %v1249_v23, 111  ;;  %v1262_v32 = vld [vmem:[#allocation5] sm:$0xff]  ;;  %v1264_v33 = vld [vmem:[#allocation5 + $0x8] sm:$0xff]  ;;  %vm420_vm5 = vcmp.lt.s32.totalorder %v1249_v23, 113 }
  0x35   : > { %vm431_vm6 = vcmp.lt.s32.totalorder %v1249_v23, 112  ;;  %v434_v37 = vperm.slane %v1262_v32, 7  ;;  %v435_v38 = vperm.slane %v1264_v33, 7  ;;  %v423_v41 = vperm.slane %v1262_v32, 6  ;;  %v305_v62 = vld [vmem:[%s1521_s4] sm:$0xff]  ;;  %s966_s27 = scalar_lea.hbm %s1523_s6, 64 }
  0x36   : > { %791 = vmatmul.msk.bf16.vlgmr.msra.gmra.mxu2 %vm323_vm0, %v1200_v8  ;;  %v424_v42 = vperm.slane %v1264_v33, 6  ;;  %vm409_vm7 = vcmp.lt.s32.totalorder %v1249_v23, 127  ;;  %v412_v56 = vperm.slane %v1262_v32, 5  ;;  %v413_v57 = vperm.slane %v1264_v33, 5 }
  0x37   : > { %792 = vmatmul.msk.bf16.vlgmr.msra.gmra.mxu3 %vm323_vm0, %v1200_v8  ;;  %vm398_vm8 = vcmp.lt.s32.totalorder %v1249_v23, 1  ;;  %v401_v7 = vperm.slane %v1262_v32, 3  ;;  %vm387_vm9 = vcmp.lt.s32.totalorder %v1249_v23, 15  ;;  %vm365_vm10 = vcmp.lt.s32.totalorder %v1249_v23, 17 }
  0x38   : > { %vm376_vm11 = vcmp.lt.s32.totalorder %v1249_v23, 16  ;;  %vm464_vm12 = vcmask 588800  }
  0xa4   : > { %v1206_v9 = vpop.permute.xlu0 %302 }
  0xb9   : > { %v336_v10 = vpop.f32.mrf.mxu2 }
  0xba   : > { %v337_v11 = vadd.f32 %v336_v10, %v1206_v9  ;;  %v349_v12 = vpop.f32.mrf.mxu3  ;;  %v402_v10 = vperm.slane %v1264_v33, 3 }
  0xbb   : > { %v350_v13 = vadd.f32 %v349_v12, %v1206_v9  ;;  %v391_v12 = vperm.slane %v1264_v33, 2 }
  0xbc   : > { %vm353_vm1 = vcmp.ge.f32.partialorder %v337_v11, 0.0  ;;  %v355_v14 = vmul.f32 0.01, %v337_v11 }
  0xbd   : > { %vm354_vm2 = vcmp.ge.f32.partialorder %v350_v13, 0.0  ;;  %v356_v15 = vmul.f32 0.01, %v350_v13 }
  0xbe   : > { %v1210_v16 = vsel %vm353_vm1, %v337_v11, %v355_v14  ;;  %v390_v11 = vperm.slane %v1262_v32, 2 }
  0xbf   : > { %v1212_v17 = vsel %vm354_vm2, %v350_v13, %v356_v15  ;;  %438 = vrot.lane.b32.xlu0 %v1210_v16, %s1023_s10 }
  0xc0   : > { %418 = vrot.lane.b32.xlu2 %v1212_v17, %s1024_s14  ;;  %440 = vrot.lane.b32.xlu1 %v1212_v17, %s1023_s10 }
  0xc1   : > { %v338_v18 = vpop.f32.mrf.mxu2 }
  0xc2   : > { %v351_v19 = vpop.f32.mrf.mxu3 }
  0xc7   : > { %429 = vrot.lane.b32.xlu0 %v1212_v17, %s1025_s15 }
  0xc8   : > { %427 = vrot.lane.b32.xlu2 %v1210_v16, %s1025_s15  ;;  %416 = vrot.lane.b32.xlu1 %v1210_v16, %s1024_s14 }
  0xcf   : > { %383 = vrot.lane.b32.xlu0 %v1210_v16, %s1026_s26 }
  0xd0   : > { %407 = vrot.lane.b32.xlu2 %v1212_v17, %s1027_s29  ;;  %405 = vrot.lane.b32.xlu1 %v1210_v16, %s1027_s29 }
  0xd7   : > { %396 = vrot.lane.b32.xlu0 %v1212_v17, %s1028_s30 }
  0xd8   : > { %394 = vrot.lane.b32.xlu2 %v1210_v16, %s1028_s30  ;;  %385 = vrot.lane.b32.xlu1 %v1212_v17, %s1026_s26 }
  0xdf   : > { %372 = vrot.lane.b32.xlu0 %v1210_v16, %s1029_s18 }
  0xe0   : > { %361 = vrot.lane.b32.xlu2 %v1212_v17, %s1030_s9  ;;  %359 = vrot.lane.b32.xlu1 %v1210_v16, %s1030_s9 }
  0xe7   : > { %314 = vperm.xlu0 %882, %v306_v20  }
  0xe8   : > { %374 = vrot.lane.b32.xlu1 %v1212_v17, %s1029_s18  ;;  %309 = vperm.xlu2 %883, %v305_v62  }
 0x11a   : > { %v419_v22 = vpop.permute.xlu2 %418 }
 0x122   : > { %v428_v34 = vpop.permute.xlu2 %427 }
 0x12a   : > { %v408_v55 = vpop.permute.xlu2 %407 }
 0x131   : > { %v439_v26 = vpop.permute.xlu0 %438 }
 0x132   : > { %v441_v27 = vpop.permute.xlu1 %440  ;;  %v395_v13 = vpop.permute.xlu2 %394 }
 0x133   : > { %v443_v28 = vsel %vm442_vm3, %v439_v26, %v441_v27  ;;  %v444_v29 = vsel %vm442_vm3, %v441_v27, %v439_v26 }
 0x134   : > { %v447_v30 = vmul.f32 %v1252_v24, %v443_v28  ;;  %v448_v31 = vmul.f32 %v1254_v25, %v444_v29 }
 0x136   : > { %v457_v35 = vpack.c.bf16 %v447_v30, %v447_v30  ;;  %v458_v36 = vpack.c.bf16 %v448_v31, %v448_v31  ;;  %v368_v30 = vperm.slane %v1262_v32, 0 }
 0x138   : > { %v470_v39 = vsel %vm468_vm4, %v457_v35, 0  ;;  %v473_v40 = vsel %vm468_vm4, %v458_v36, 0  ;;  %v379_v35 = vperm.slane %v1262_v32, 1  ;;  %v380_v36 = vperm.slane %v1264_v33, 1 }
 0x139   : > { %478 = vmatpush.bf16.msrb.mxu2 %v470_v39  ;;  %492 = vmatpush.bf16.msrb.mxu3 %v473_v40  ;;  %v430_v43 = vpop.permute.xlu0 %429 }
 0x13a   : > { %v417_v44 = vpop.permute.xlu1 %416  ;;  %v432_v45 = vsel %vm431_vm6, %v428_v34, %v430_v43  ;;  %v433_v46 = vsel %vm431_vm6, %v430_v43, %v428_v34  ;;  %v362_v31 = vpop.permute.xlu2 %361  ;;  %v369_v34 = vperm.slane %v1264_v33, 0 }
 0x13b   : > { %v421_v47 = vsel %vm420_vm5, %v417_v44, %v419_v22  ;;  %v422_v48 = vsel %vm420_vm5, %v419_v22, %v417_v44  ;;  %v436_v49 = vmul.f32 %v434_v37, %v432_v45  ;;  %v437_v50 = vmul.f32 %v435_v38, %v433_v46 }
 0x13c   : > { %v425_v51 = vmul.f32 %v423_v41, %v421_v47  ;;  %v426_v52 = vmul.f32 %v424_v42, %v422_v48 }
 0x13e   : > { %v455_v53 = vpack.c.bf16 %v436_v49, %v425_v51  ;;  %v456_v54 = vpack.c.bf16 %v437_v50, %v426_v52 }
 0x140   : > { %479 = vmatpush.bf16.msrb.mxu2 %v455_v53  ;;  %493 = vmatpush.bf16.msrb.mxu3 %v456_v54  ;;  %v1353_v53 = vld [vmem:[%s1520_s3] sm:$0xff] }
 0x141   : > { %v384_v58 = vpop.permute.xlu0 %383 }
 0x142   : > { %v406_v59 = vpop.permute.xlu1 %405  ;;  %v1359_v54 = vpop.permute.xlu2 %309 }
 0x143   : > { %v410_v60 = vsel %vm409_vm7, %v406_v59, %v408_v55  ;;  %v411_v61 = vsel %vm409_vm7, %v408_v55, %v406_v59 }
 0x144   : > { %v414_v63 = vmul.f32 %v412_v56, %v410_v60  ;;  %v415_v0 = vmul.f32 %v413_v57, %v411_v61 }
 0x146   : > { %v453_v4 = vpack.c.bf16 %v414_v63, %v1210_v16  ;;  %v454_v6 = vpack.c.bf16 %v415_v0, %v1212_v17 }
 0x148   : > { %480 = vmatpush.bf16.msrb.mxu2 %v453_v4  ;;  %494 = vmatpush.bf16.msrb.mxu3 %v454_v6 }
 0x149   : > { %v397_v14 = vpop.permute.xlu0 %396 }
 0x14a   : > { %v386_v15 = vpop.permute.xlu1 %385  ;;  %v399_v16 = vsel %vm398_vm8, %v395_v13, %v397_v14  ;;  %v400_v17 = vsel %vm398_vm8, %v397_v14, %v395_v13 }
 0x14b   : > { %v388_v18 = vsel %vm387_vm9, %v384_v58, %v386_v15  ;;  %v389_v19 = vsel %vm387_vm9, %v386_v15, %v384_v58  ;;  %v403_v20 = vmul.f32 %v401_v7, %v400_v17  ;;  %v404_v21 = vmul.f32 %v402_v10, %v399_v16 }
 0x14c   : > { %v392_v22 = vmul.f32 %v390_v11, %v389_v19  ;;  %v393_v26 = vmul.f32 %v391_v12, %v388_v18 }
 0x14e   : > { %v451_v27 = vpack.c.bf16 %v403_v20, %v392_v22  ;;  %v452_v28 = vpack.c.bf16 %v404_v21, %v393_v26 }
 0x150   : > { %481 = vmatpush.bf16.msrb.mxu2 %v451_v27  ;;  %495 = vmatpush.bf16.msrb.mxu3 %v452_v28 }
 0x151   : > { %v373_v43 = vpop.permute.xlu0 %372 }
 0x152   : > { %v360_v29 = vpop.permute.xlu1 %359 }
 0x153   : > { %v366_v39 = vsel %vm365_vm10, %v360_v29, %v362_v31  ;;  %v367_v40 = vsel %vm365_vm10, %v362_v31, %v360_v29 }
 0x154   : > { %v370_v47 = vmul.f32 %v368_v30, %v367_v40  ;;  %v371_v48 = vmul.f32 %v369_v34, %v366_v39 }
 0x159   : > { %v1363_v63 = vpop.permute.xlu0 %314 }
 0x15a   : > { %v375_v44 = vpop.permute.xlu1 %374 }
 0x15b   : > { %v377_v45 = vsel %vm376_vm11, %v373_v43, %v375_v44  ;;  %v378_v46 = vsel %vm376_vm11, %v375_v44, %v373_v43 }
 0x15c   : > { %v381_v49 = vmul.f32 %v379_v35, %v378_v46  ;;  %v382_v50 = vmul.f32 %v380_v36, %v377_v45 }
 0x15e   : > { %v449_v51 = vpack.c.bf16 %v381_v49, %v370_v47  ;;  %v450_v52 = vpack.c.bf16 %v382_v50, %v371_v48 }
 0x160   : > { %482 = vmatpush.bf16.msrb.mxu2 %v449_v51  ;;  %496 = vmatpush.bf16.msrb.mxu3 %v450_v52 }
 0x163   : > { %797 = vmatmul.msk.bf16.vlgmr.msrb.gmra.mxu2 %vm464_vm12, %v1353_v53  ;;  %798 = vmatmul.msk.bf16.vlgmr.msrb.gmra.mxu3 %vm464_vm12, %v1353_v53 }
 0x1e6   : > { %v484_v55 = vpop.f32.mrf.mxu2  ;;  %v498_v58 = vpop.f32.mrf.mxu3 }
 0x1e7   : > { %v485_v59 = vadd.f32 %v484_v55, %v1359_v54  ;;  %v499_v60 = vadd.f32 %v498_v58, %v1359_v54 }
 0x1e9   : > { %v507_v61 = vmul.f32 0.01, %v485_v59  ;;  %v508_v62 = vmul.f32 0.01, %v499_v60  ;;  %vm503_vm13 = vcmp.ge.f32.partialorder %v485_v59, 0.0  ;;  %vm504_vm14 = vcmp.ge.f32.partialorder %v499_v60, 0.0 }
 0x1eb   : > { %v511_v14 = vsel %vm503_vm13, %v485_v59, %v507_v61  ;;  %v512_v15 = vsel %vm504_vm14, %v499_v60, %v508_v62 }
 0x1ec   : > { %v1368_v20 = vadd.f32 %v511_v14, %v1182_v1  ;;  %v1374_v22 = vadd.f32 %v512_v15, %v1186_v3 }
 0x1ee   : > { %v486_v0 = vpop.f32.mrf.mxu2  ;;  %v500_v4 = vpop.f32.mrf.mxu3 }
 0x1ef   : > { %v487_v6 = vadd.f32 %v486_v0, %v1363_v63  ;;  %v501_v13 = vadd.f32 %v500_v4, %v1363_v63 }
 0x1f1   : > { %vm505_vm15 = vcmp.ge.f32.partialorder %v487_v6, 0.0  ;;  %v509_v16 = vmul.f32 0.01, %v487_v6  ;;  %vm506_vm1 = vcmp.ge.f32.partialorder %v501_v13, 0.0  ;;  %v510_v17 = vmul.f32 0.01, %v501_v13 }
 0x1f3   : > { %v513_v18 = vsel %vm505_vm15, %v487_v6, %v509_v16  ;;  %v514_v19 = vsel %vm506_vm1, %v501_v13, %v510_v17 }
 0x1f4   : > { %v1371_v21 = vadd.f32 %v513_v18, %v1184_v2  ;;  %v1377_v26 = vadd.f32 %v514_v19, %v1190_v5 }
 0x1f6   : > { %v519_v27 = vpack.c.bf16 %v1371_v21, %v1368_v20  ;;  %v520_v28 = vpack.c.bf16 %v1377_v26, %v1374_v22 }
 0x1f8   : > { %528 = vmatpush.bf16.msra.mxu0 %v519_v27  ;;  %541 = vmatpush.bf16.msra.mxu1 %v520_v28 }
 0x1fb   : > { %799 = vmatmul.msk.bf16.vlgmr.msra.gmra.mxu0 %vm323_vm0, %v1200_v8  ;;  %800 = vmatmul.msk.bf16.vlgmr.msra.gmra.mxu1 %vm323_vm0, %v1200_v8 }
 0x278   : > { %v530_v1 = vpop.f32.mrf.mxu0  ;;  %v543_v2 = vpop.f32.mrf.mxu1 }
 0x279   : > { %v531_v3 = vadd.f32 %v530_v1, %v1206_v9  ;;  %v544_v5 = vadd.f32 %v543_v2, %v1206_v9 }
 0x27b   : > { %vm547_vm2 = vcmp.ge.f32.partialorder %v531_v3, 0.0  ;;  %v549_v29 = vmul.f32 0.01, %v531_v3  ;;  %vm548_vm13 = vcmp.ge.f32.partialorder %v544_v5, 0.0  ;;  %v550_v31 = vmul.f32 0.01, %v544_v5 }
 0x27d   : > { %v551_v39 = vsel %vm547_vm2, %v531_v3, %v549_v29  ;;  %v552_v40 = vsel %vm548_vm13, %v544_v5, %v550_v31 }
 0x27e   : > { %611 = vrot.lane.b32.xlu2 %v552_v40, %s1023_s10  ;;  %593 = vrot.lane.b32.xlu0 %v551_v39, %s1024_s14 }
 0x27f   : > { %609 = vrot.lane.b32.xlu1 %v551_v39, %s1023_s10  ;;  %s810_s10 = sshll.u32 %s1089_s25, 4 }
 0x280   : > { %v532_v43 = vpop.f32.mrf.mxu0  ;;  %v545_v8 = vpop.f32.mrf.mxu1 }
 0x286   : > { %601 = vrot.lane.b32.xlu2 %v551_v39, %s1025_s15  ;;  %603 = vrot.lane.b32.xlu0 %v552_v40, %s1025_s15 }
 0x287   : > { %595 = vrot.lane.b32.xlu1 %v552_v40, %s1024_s14 }
 0x28e   : > { %587 = vrot.lane.b32.xlu2 %v552_v40, %s1027_s29  ;;  %569 = vrot.lane.b32.xlu0 %v551_v39, %s1026_s26 }
 0x28f   : > { %585 = vrot.lane.b32.xlu1 %v551_v39, %s1027_s29  ;;  %s288_s29 = scalar_lea.vmem [#allocation7], %s788_s12  ;;  %s682_s12 = scalar_lea.sflag [#allocation4], %s1168_s19 }
 0x290   : > { %s694_s25 = sshll.u32 %s288_s29, 4  ;;  %s695_s25 = int_to_ptr.vmem [resolvable:$true] %s694_s25 }
 0x296   : > { %577 = vrot.lane.b32.xlu2 %v551_v39, %s1028_s30  ;;  %579 = vrot.lane.b32.xlu0 %v552_v40, %s1028_s30 }
 0x297   : > { %571 = vrot.lane.b32.xlu1 %v552_v40, %s1026_s26  ;;  %s693_s26 = scalar_lea.hbm %s1523_s6, %s810_s10 }
 0x298   : > { %s696_s30 = sshll.u32 %s693_s26, 4  ;;  %s697_s30 = int_to_ptr.hbm [resolvable:$true] %s696_s30 }
 0x29e   : > { %555 = vrot.lane.b32.xlu2 %v552_v40, %s1030_s9  ;;  %561 = vrot.lane.b32.xlu0 %v551_v39, %s1029_s18 }
 0x29f   : > { %553 = vrot.lane.b32.xlu1 %v551_v39, %s1030_s9  ;;  %s960_s9 = sshra.s32 %s697_s30, 4  ;;  %s961_s9 = int_to_ptr.hbm [resolvable:$true] %s960_s9 }
 0x2a0   : > { %s962_s13 = scalar_lea.hbm %s961_s9, 32  ;;  %p967_p11 = scmp.lt.s32.totalorder %s961_s9, %s1523_s6 }
 0x2a1   : > { %p963_p1 = scmp.ne.s32.totalorder %s961_s9, %s962_s13  ;;  %p968_p9 = scmp.lt.s32.totalorder %s966_s27, %s962_s13 }
 0x2a3   : > { %p964_p4 = pnand %p963_p1, %p1138_p7  ;;  %p969_p2 = por %p968_p9, %p967_p11 }
 0x2a5   : > { %p965_p8 = pneg %p964_p4 }
 0x2a7   : > { %563 = vrot.lane.b32.xlu1 %v552_v40, %s1029_s18  ;;  %p970_p10 = pnand %p969_p2, %p965_p8 }
 0x2d8   : > { %v612_v9 = vpop.permute.xlu2 %611 }
 0x2e0   : > { %v602_v50 = vpop.permute.xlu2 %601 }
 0x2e8   : > { %v588_v16 = vpop.permute.xlu2 %587 }
 0x2f0   : > { %v594_v44 = vpop.permute.xlu0 %593  ;;  %v578_v28 = vpop.permute.xlu2 %577 }
 0x2f1   : > { %v610_v45 = vpop.permute.xlu1 %609 }
 0x2f2   : > { %v613_v46 = vsel %vm442_vm3, %v610_v45, %v612_v9  ;;  %v614_v47 = vsel %vm442_vm3, %v612_v9, %v610_v45 }
 0x2f3   : > { %v615_v48 = vmul.f32 %v1252_v24, %v613_v46  ;;  %v616_v49 = vmul.f32 %v1254_v25, %v614_v47 }
 0x2f5   : > { %v625_v51 = vpack.c.bf16 %v615_v48, %v615_v48  ;;  %v626_v52 = vpack.c.bf16 %v616_v49, %v616_v49 }
 0x2f7   : > { %v628_v55 = vsel %vm468_vm4, %v625_v51, 0  ;;  %v631_v58 = vsel %vm468_vm4, %v626_v52, 0 }
 0x2f8   : > { %636 = vmatpush.bf16.msrb.mxu0 %v628_v55  ;;  %650 = vmatpush.bf16.msrb.mxu1 %v631_v58  ;;  %v604_v59 = vpop.permute.xlu0 %603  ;;  %v556_v9 = vpop.permute.xlu2 %555 }
 0x2f9   : > { %v605_v60 = vsel %vm431_vm6, %v602_v50, %v604_v59  ;;  %v606_v61 = vsel %vm431_vm6, %v604_v59, %v602_v50  ;;  %v596_v62 = vpop.permute.xlu1 %595 }
 0x2fa   : > { %v607_v24 = vmul.f32 %v605_v60, %v434_v37  ;;  %v608_v25 = vmul.f32 %v606_v61, %v435_v38  ;;  %v597_v0 = vsel %vm420_vm5, %v594_v44, %v596_v62  ;;  %v598_v4 = vsel %vm420_vm5, %v596_v62, %v594_v44 }
 0x2fb   : > { %v599_v6 = vmul.f32 %v597_v0, %v423_v41  ;;  %v600_v13 = vmul.f32 %v598_v4, %v424_v42 }
 0x2fd   : > { %v623_v14 = vpack.c.bf16 %v607_v24, %v599_v6  ;;  %v624_v15 = vpack.c.bf16 %v608_v25, %v600_v13 }
 0x2ff   : > { %637 = vmatpush.bf16.msrb.mxu0 %v623_v14  ;;  %651 = vmatpush.bf16.msrb.mxu1 %v624_v15 }
 0x300   : > { %v570_v37 = vpop.permute.xlu0 %569 }
 0x301   : > { %v586_v17 = vpop.permute.xlu1 %585 }
 0x302   : > { %v589_v38 = vsel %vm409_vm7, %v586_v17, %v588_v16  ;;  %v590_v18 = vsel %vm409_vm7, %v588_v16, %v586_v17 }
 0x303   : > { %v591_v19 = vmul.f32 %v589_v38, %v412_v56  ;;  %v592_v41 = vmul.f32 %v590_v18, %v413_v57 }
 0x305   : > { %v621_v42 = vpack.c.bf16 %v591_v19, %v551_v39  ;;  %v622_v27 = vpack.c.bf16 %v592_v41, %v552_v40 }
 0x307   : > { %638 = vmatpush.bf16.msrb.mxu0 %v621_v42  ;;  %652 = vmatpush.bf16.msrb.mxu1 %v622_v27 }
 0x308   : > { %v580_v1 = vpop.permute.xlu0 %579 }
 0x309   : > { %v581_v2 = vsel %vm398_vm8, %v578_v28, %v580_v1  ;;  %v582_v3 = vsel %vm398_vm8, %v580_v1, %v578_v28  ;;  %v572_v5 = vpop.permute.xlu1 %571 }
 0x30a   : > { %v583_v29 = vmul.f32 %v582_v3, %v401_v7  ;;  %v584_v56 = vmul.f32 %v581_v2, %v402_v10  ;;  %v573_v57 = vsel %vm387_vm9, %v570_v37, %v572_v5  ;;  %v574_v31 = vsel %vm387_vm9, %v572_v5, %v570_v37 }
 0x30b   : > { %v575_v39 = vmul.f32 %v574_v31, %v390_v11  ;;  %v576_v40 = vmul.f32 %v573_v57, %v391_v12 }
 0x30d   : > { %v619_v43 = vpack.c.bf16 %v583_v29, %v575_v39  ;;  %v620_v8 = vpack.c.bf16 %v584_v56, %v576_v40 }
 0x30f   : > { %639 = vmatpush.bf16.msrb.mxu0 %v619_v43  ;;  %653 = vmatpush.bf16.msrb.mxu1 %v620_v8 }
 0x310   : > { %v562_v45 = vpop.permute.xlu0 %561 }
 0x311   : > { %v554_v7 = vpop.permute.xlu1 %553 }
 0x312   : > { %v557_v10 = vsel %vm365_vm10, %v554_v7, %v556_v9  ;;  %v558_v44 = vsel %vm365_vm10, %v556_v9, %v554_v7 }
 0x313   : > { %v559_v47 = vmul.f32 %v558_v44, %v368_v30  ;;  %v560_v48 = vmul.f32 %v557_v10, %v369_v34 }
 0x319   : > { %v564_v46 = vpop.permute.xlu1 %563 }
 0x31a   : > { %v565_v11 = vsel %vm376_vm11, %v562_v45, %v564_v46  ;;  %v566_v12 = vsel %vm376_vm11, %v564_v46, %v562_v45 }
 0x31b   : > { %v567_v49 = vmul.f32 %v566_v12, %v379_v35  ;;  %v568_v50 = vmul.f32 %v565_v11, %v380_v36 }
 0x31d   : > { %v617_v51 = vpack.c.bf16 %v567_v49, %v559_v47  ;;  %v618_v52 = vpack.c.bf16 %v568_v50, %v560_v48 }
 0x31f   : > { %640 = vmatpush.bf16.msrb.mxu0 %v617_v51  ;;  %654 = vmatpush.bf16.msrb.mxu1 %v618_v52 }
 0x322   : > { %801 = vmatmul.msk.bf16.vlgmr.msrb.gmra.mxu0 %vm464_vm12, %v1353_v53  ;;  %802 = vmatmul.msk.bf16.vlgmr.msrb.gmra.mxu1 %vm464_vm12, %v1353_v53 }
 0x39f   : > { %v642_v23 = vpop.f32.mrf.mxu0  ;;  %v656_v30 = vpop.f32.mrf.mxu1 }
 0x3a0   : > { %v643_v32 = vadd.f32 %v642_v23, %v1359_v54  ;;  %v657_v34 = vadd.f32 %v656_v30, %v1359_v54 }
 0x3a2   : > { %vm661_vm0 = vcmp.ge.f32.partialorder %v643_v32, 0.0  ;;  %v665_v33 = vmul.f32 0.01, %v643_v32  ;;  %vm662_vm3 = vcmp.ge.f32.partialorder %v657_v34, 0.0  ;;  %v666_v35 = vmul.f32 0.01, %v657_v34 }
 0x3a4   : > { %v669_v36 = vsel %vm661_vm0, %v643_v32, %v665_v33  ;;  %v670_v55 = vsel %vm662_vm3, %v657_v34, %v666_v35 }
 0x3a5   : > { %v673_v58 = vadd.f32 %v669_v36, %v1368_v20  ;;  %v674_v59 = vadd.f32 %v670_v55, %v1374_v22 }
 0x3a7   : > { %677 = vst [vmem:[%s288_s29] sm:$0xff] %v673_v58  ;;  %v644_v53 = vpop.f32.mrf.mxu0  ;;  %v658_v54 = vpop.f32.mrf.mxu1 }
 0x3a8   : > { %678 = vst [vmem:[%s288_s29 + $0x8] sm:$0xff] %v674_v59  ;;  %v645_v60 = vadd.f32 %v644_v53, %v1363_v63  ;;  %v659_v61 = vadd.f32 %v658_v54, %v1363_v63 }
 0x3aa   : > { %vm663_vm4 = vcmp.ge.f32.partialorder %v645_v60, 0.0  ;;  %v667_v20 = vmul.f32 0.01, %v645_v60  ;;  %vm664_vm5 = vcmp.ge.f32.partialorder %v659_v61, 0.0  ;;  %v668_v22 = vmul.f32 0.01, %v659_v61 }
 0x3ac   : > { %v671_v62 = vsel %vm663_vm4, %v645_v60, %v667_v20  ;;  %v672_v24 = vsel %vm664_vm5, %v659_v61, %v668_v22 }
 0x3ad   : > { %v675_v25 = vadd.f32 %v671_v62, %v1371_v21  ;;  %v676_v0 = vadd.f32 %v672_v24, %v1377_v26 }
 0x3af   : > { %679 = vst [vmem:[%s288_s29 + $0x10] sm:$0xff] %v675_v25 }
 0x3b0   : > { %680 = vst [vmem:[%s288_s29 + $0x18] sm:$0xff] %v676_v0 }
 0x3b1   : > { %973 = shalt.err (!%p970_p10)
}
 0x3b2   : > { %s1031_s19 = smov 256   ;;  %s1032_s10 = smov 512  }
 0x3b3   : > { %817 = dma.vmem_to_hbm [thread:$0]  (%p1138_p7), %s695_s25, 512, %s697_s30, %s682_s12, %s1031_s19, %s1032_s10, %s1029_s18  }
 0x3b4 PF: > { %s711_s14 = sand.u32 1, %s1004_s21   ;;  %p1535_p12 = scmp.ge.s32.totalorder %s1016_s24, 2 }
 0x3b5   : > { %s712_s15 = scalar_lea.sflag [#allocation4], %s711_s14 }
 0x3b6   : > { %p828_p13 = pnand %p1535_p12, %p1103_p6 }
 0x3b8   : > { %p829_p0 = pneg %p828_p13 }
 0x3ba   : > { %999 = dma.done.wait (%p829_p0), %s712_s15, 512  }
 0x3bb   : > { %1001 = vsyncadd (%p829_p0), %s712_s15, 4294966784  ;;  %p20_p3 = scmp.ge.s32.totalorder %s1121_s11, 4   ;;  %s1536_s21 = smov %s1008_s22 }
 0x3bc   : > { %s1537_s22 = smov %s1012_s23  ;;  %s1538_s23 = smov %s1134_s16 }
 0x3bd   : > { %s1539_s24 = smov %s1121_s11  ;;  %22 = sbr.rel (!%p20_p3) target bundleno = 8 (0x8), region = 93 }
 0x3c2   :  { %718 = vsyncpa [#allocation3], 1 }
 0x3c3   :  { %720 = vsyncpa [#allocation3 + $0x1], 1 }
 0x3c4   :  { %721 = vsyncpa [#allocation6], 1 }
 0x3c5   :  { %722 = vsyncpa [#allocation4], 1 }
 0x3c6   :  { %724 = vsyncpa [#allocation4 + $0x1], 1 }

</bundles_post_ra>
